<compile_context>
chip_gen: v6e
topology: v6e:2x2x1
jax: 0.10.0
libtpu: 0.0.40
codegen_flags: <defaults>
</compile_context>

<pallas_src>
import functools

import jax
import jax.numpy as jnp
from jax.experimental import pallas as pl
from jax.experimental.pallas import tpu as pltpu

CLUSTER_DIM = 100
HIDDEN = 256
INPUT_DIM = 96
OUTPUT = 100
OUTPUT_PAD = 128          # lane-dense output tile; real outputs live in lanes [0, 100)
DEFAULT_BLOCK_M = 256     # batch tile (fits comfortably in v7x's 32 MiB scoped VMEM)


def _mlp_kernel(x_ref, thr_ref,
                w1_ref, b1_ref, w2_ref, b2_ref,
                wt1_ref, bt1_ref, wt2_ref, bt2_ref,
                w5_ref, b5_ref,
                out_ref):
    relu = lambda v: jnp.maximum(v, 0.0)

    x = x_ref[...]        # (TM, 96)  f32
    thr = thr_ref[...]    # (TM, 1)   f32

    # out1 = relu(nn1(x)); out2 = relu(nn2(out1))  -- bf16 MXU inputs, f32 accumulate
    out1 = relu(jnp.dot(x.astype(jnp.bfloat16), w1_ref[...],
                        preferred_element_type=jnp.float32) + b1_ref[...])
    out2 = relu(jnp.dot(out1.astype(jnp.bfloat16), w2_ref[...],
                        preferred_element_type=jnp.float32) + b2_ref[...])

    # thres1: Linear(1, H) as a broadcast multiply (avoids a K=1 matmul), fp32 VPU
    t1 = relu(thr * wt1_ref[...] + bt1_ref[...])                              # (TM, H)
    # thres2: Linear(H, 1) as a lane reduction (avoids an N=1 matmul), XLU
    t2 = jnp.sum(t1 * wt2_ref[...], axis=-1, keepdims=True) + bt2_ref[...]    # (TM, 1)

    # out5 = nn5(out2); probability = sigmoid(out5 + thresholds_2)
    out5 = jnp.dot(out2.astype(jnp.bfloat16), w5_ref[...],
                   preferred_element_type=jnp.float32) + b5_ref[...]          # (TM, 128)
    out_ref[...] = jax.nn.sigmoid(out5 + t2)


def _round_up(n, m):
    return (n + m - 1) // m * m


def _init_linear(key, fan_in, fan_out):
    """PyTorch-style nn.Linear init: U(-1/sqrt(fan_in), 1/sqrt(fan_in)).
    W is stored pre-transposed to (fan_in, fan_out); bias as (1, fan_out)."""
    kw, kb = jax.random.split(key)
    bound = 1.0 / (fan_in ** 0.5)
    w = jax.random.uniform(kw, (fan_in, fan_out), jnp.float32, -bound, bound)
    b = jax.random.uniform(kb, (1, fan_out), jnp.float32, -bound, bound)
    return w, b


def init_params(key):
    """Full PyTorch-module parameter set (including the dead dist/nn4 branch)."""
    keys = jax.random.split(key, 8)
    w1, b1 = _init_linear(keys[0], INPUT_DIM, HIDDEN)        # nn1
    w2, b2 = _init_linear(keys[1], HIDDEN, HIDDEN)           # nn2
    wd1, bd1 = _init_linear(keys[2], CLUSTER_DIM, HIDDEN)    # dist1 (dead in forward)
    wd2, bd2 = _init_linear(keys[3], HIDDEN, HIDDEN)         # dist2 (dead in forward)
    w4, b4 = _init_linear(keys[4], HIDDEN, HIDDEN)           # nn4   (dead in forward)
    w5, b5 = _init_linear(keys[5], HIDDEN, OUTPUT)           # nn5
    wt1, bt1 = _init_linear(keys[6], 1, HIDDEN)              # thres1  (1, H)
    wt2, bt2 = _init_linear(keys[7], HIDDEN, 1)              # thres2  (H, 1)
    return (w1, b1, w2, b2, wd1, bd1, wd2, bd2, wt1, bt1, wt2, bt2, w4, b4, w5, b5)


def prepare_kernel_params(params):
    """One-time prep: prune the dead branch, cast matmul weights to bf16,
    pad nn5's output dim to 128 lanes, reshape thres2 weight for lane reduction."""
    (w1, b1, w2, b2, wd1, bd1, wd2, bd2,
     wt1, bt1, wt2, bt2, w4, b4, w5, b5) = params
    del wd1, bd1, wd2, bd2, w4, b4   # distances only feed out4, which is unused
    w5p = jnp.zeros((HIDDEN, OUTPUT_PAD), jnp.float32).at[:, :OUTPUT].set(w5)
    b5p = jnp.zeros((1, OUTPUT_PAD), jnp.float32).at[:, :OUTPUT].set(b5)
    return (w1.astype(jnp.bfloat16), b1,
            w2.astype(jnp.bfloat16), b2,
            wt1, bt1, wt2.reshape(1, HIDDEN), bt2,
            w5p.astype(jnp.bfloat16), b5p)


@functools.partial(jax.jit, static_argnames=("block_m",))
def _forward_impl(x, thresholds, kparams, block_m):
    bp = x.shape[0]
    (w1, b1, w2, b2, wt1, bt1, wt2, bt2, w5, b5) = kparams

    def batch_spec(feat):
        return pl.BlockSpec((block_m, feat), lambda i: (i, 0))

    def weight_spec(arr):
        # Full-array block, constant index_map -> stays VMEM-resident across the grid.
        return pl.BlockSpec(arr.shape, lambda i: (0, 0))

    return pl.pallas_call(
        _mlp_kernel,
        out_shape=jax.ShapeDtypeStruct((bp, OUTPUT_PAD), jnp.float32),
        grid=(bp // block_m,),
        in_specs=[batch_spec(INPUT_DIM), batch_spec(1),
                  weight_spec(w1), weight_spec(b1),
                  weight_spec(w2), weight_spec(b2),
                  weight_spec(wt1), weight_spec(bt1),
                  weight_spec(wt2), weight_spec(bt2),
                  weight_spec(w5), weight_spec(b5)],
        out_specs=pl.BlockSpec((block_m, OUTPUT_PAD), lambda i: (i, 0)),
        compiler_params=pltpu.CompilerParams(
            dimension_semantics=("parallel",)),
    )(x, thresholds, w1, b1, w2, b2, wt1, bt1, wt2, bt2, w5, b5)


def model_forward(x, distances, thresholds, kernel_params, *,
                  max_block_m=DEFAULT_BLOCK_M):
    """Forward pass matching the PyTorch Model. `distances` is accepted for
    interface fidelity but is dead in the reference forward (only feeds the
    unused out4), so it is not passed to the kernel."""
    del distances
    b = x.shape[0]
    block_m = min(max_block_m, _round_up(b, 8))
    bp = _round_up(b, block_m)
    if bp != b:
        x = jnp.pad(x, ((0, bp - b), (0, 0)))
        thresholds = jnp.pad(thresholds, ((0, bp - b), (0, 0)))
    out = _forward_impl(x, thresholds, kernel_params, block_m)
    return out[:b, :OUTPUT]


def _reference_forward(x, distances, thresholds, params):
    """Pure-JAX reference mirroring the PyTorch forward, with the same bf16
    matmul-operand casts the kernel uses (fp32 accumulation)."""
    (w1, b1, w2, b2, wd1, bd1, wd2, bd2,
     wt1, bt1, wt2, bt2, w4, b4, w5, b5) = params
    relu = jax.nn.relu
    bf16, f32 = jnp.bfloat16, jnp.float32
    out1 = relu(jnp.dot(x.astype(bf16), w1.astype(bf16),
                        preferred_element_type=f32) + b1)
    out2 = relu(jnp.dot(out1.astype(bf16), w2.astype(bf16),
                        preferred_element_type=f32) + b2)
    d1 = relu(distances @ wd1 + bd1)
    d2 = relu(d1 @ wd2 + bd2)
    t1 = relu(thresholds @ wt1 + bt1)
    t2 = t1 @ wt2 + bt2
    _ = relu(((out2 + d2) * 0.5) @ w4 + b4)   # out4: computed but unused, as in reference
    out5 = jnp.dot(out2.astype(bf16), w5.astype(bf16),
                   preferred_element_type=f32) + b5
    return jax.nn.sigmoid(out5 + t2)


if __name__ == "__main__":
    key = jax.random.PRNGKey(0)
    kp, kx, kd, kt = jax.random.split(key, 4)

    params = init_params(kp)
    kernel_params = prepare_kernel_params(params)

    B = 8
    x = jax.random.normal(kx, (B, INPUT_DIM), jnp.float32)
    distances = jax.random.normal(kd, (B, CLUSTER_DIM), jnp.float32)
    thresholds = jax.random.normal(kt, (B, 1), jnp.float32)

    prob = model_forward(x, distances, thresholds, kernel_params)
    prob = jax.block_until_ready(prob)

    ref = _reference_forward(x, distances, thresholds, params)
    assert prob.shape == (B, OUTPUT)
    assert jnp.allclose(prob, ref, atol=2e-3, rtol=2e-3), "mismatch vs reference"

    print("KERNEL_OK")
</pallas_src>

<mosaic_0001>
module attributes {stable_mosaic.version = 11 : i64} {
  func.func @_mlp_kernel(%arg0: i32, %arg1: memref<8x96xf32, #tpu.memory_space<vmem>>, %arg2: memref<8x1xf32, #tpu.memory_space<vmem>>, %arg3: memref<96x256xbf16, #tpu.memory_space<vmem>>, %arg4: memref<1x256xf32, #tpu.memory_space<vmem>>, %arg5: memref<256x256xbf16, #tpu.memory_space<vmem>>, %arg6: memref<1x256xf32, #tpu.memory_space<vmem>>, %arg7: memref<1x256xf32, #tpu.memory_space<vmem>>, %arg8: memref<1x256xf32, #tpu.memory_space<vmem>>, %arg9: memref<1x256xf32, #tpu.memory_space<vmem>>, %arg10: memref<1x1xf32, #tpu.memory_space<vmem>>, %arg11: memref<256x128xbf16, #tpu.memory_space<vmem>>, %arg12: memref<1x128xf32, #tpu.memory_space<vmem>>, %arg13: memref<8x128xf32, #tpu.memory_space<vmem>>) attributes {dimension_semantics = [#tpu.dimension_semantics<parallel>], iteration_bounds = array<i64: 1>, scalar_prefetch = 0 : i64, scratch_operands = 0 : i64, tpu.core_type = #tpu.core_type<tc>, window_params = [{transform_indices = @transform_0, window_bounds = array<i64: 8, 96>}, {transform_indices = @transform_1, window_bounds = array<i64: 8, 1>}, {pipeline_mode = #tpu.pipeline_mode<synchronous>, transform_indices = @transform_2, window_bounds = array<i64: 96, 256>}, {pipeline_mode = #tpu.pipeline_mode<synchronous>, transform_indices = @transform_3, window_bounds = array<i64: 1, 256>}, {pipeline_mode = #tpu.pipeline_mode<synchronous>, transform_indices = @transform_4, window_bounds = array<i64: 256, 256>}, {pipeline_mode = #tpu.pipeline_mode<synchronous>, transform_indices = @transform_5, window_bounds = array<i64: 1, 256>}, {pipeline_mode = #tpu.pipeline_mode<synchronous>, transform_indices = @transform_6, window_bounds = array<i64: 1, 256>}, {pipeline_mode = #tpu.pipeline_mode<synchronous>, transform_indices = @transform_7, window_bounds = array<i64: 1, 256>}, {pipeline_mode = #tpu.pipeline_mode<synchronous>, transform_indices = @transform_8, window_bounds = array<i64: 1, 256>}, {pipeline_mode = #tpu.pipeline_mode<synchronous>, transform_indices = @transform_9, window_bounds = array<i64: 1, 1>}, {pipeline_mode = #tpu.pipeline_mode<synchronous>, transform_indices = @transform_10, window_bounds = array<i64: 256, 128>}, {pipeline_mode = #tpu.pipeline_mode<synchronous>, transform_indices = @transform_11, window_bounds = array<i64: 1, 128>}, {transform_indices = @transform_12, window_bounds = array<i64: 8, 128>}]} {
    %c0 = arith.constant 0 : index
    %c0_0 = arith.constant 0 : index
    %0 = vector.load %arg1[%c0, %c0_0] : memref<8x96xf32, #tpu.memory_space<vmem>>, vector<8x96xf32>
    %c0_1 = arith.constant 0 : index
    %c0_2 = arith.constant 0 : index
    %1 = vector.load %arg2[%c0_1, %c0_2] : memref<8x1xf32, #tpu.memory_space<vmem>>, vector<8x1xf32>
    %2 = arith.truncf %0 : vector<8x96xf32> to vector<8x96xbf16>
    %c0_3 = arith.constant 0 : index
    %c0_4 = arith.constant 0 : index
    %3 = vector.load %arg3[%c0_3, %c0_4] : memref<96x256xbf16, #tpu.memory_space<vmem>>, vector<96x256xbf16>
    %cst = arith.constant dense<0.000000e+00> : vector<8x256xf32>
    %4 = tpu.matmul %2, %3, %cst {dimension_numbers = #tpu.dot_dimension_numbers<[1], [0], [0], [1], [0, 0, 1, 1], [], []>} : vector<8x96xbf16>, vector<96x256xbf16>, vector<8x256xf32> -> vector<8x256xf32>
    %c0_5 = arith.constant 0 : index
    %c0_6 = arith.constant 0 : index
    %5 = vector.load %arg4[%c0_5, %c0_6] : memref<1x256xf32, #tpu.memory_space<vmem>>, vector<1x256xf32>
    %6 = vector.broadcast %5 : vector<1x256xf32> to vector<8x256xf32>
    %7 = arith.addf %4, %6 : vector<8x256xf32>
    %cst_7 = arith.constant 0.000000e+00 : f32
    %8 = vector.broadcast %cst_7 : f32 to vector<8x256xf32>
    %9 = arith.maximumf %7, %8 : vector<8x256xf32>
    %10 = arith.truncf %9 : vector<8x256xf32> to vector<8x256xbf16>
    %c0_8 = arith.constant 0 : index
    %c0_9 = arith.constant 0 : index
    %11 = vector.load %arg5[%c0_8, %c0_9] : memref<256x256xbf16, #tpu.memory_space<vmem>>, vector<256x256xbf16>
    %cst_10 = arith.constant dense<0.000000e+00> : vector<8x256xf32>
    %12 = tpu.matmul %10, %11, %cst_10 {dimension_numbers = #tpu.dot_dimension_numbers<[1], [0], [0], [1], [0, 0, 1, 1], [], []>} : vector<8x256xbf16>, vector<256x256xbf16>, vector<8x256xf32> -> vector<8x256xf32>
    %c0_11 = arith.constant 0 : index
    %c0_12 = arith.constant 0 : index
    %13 = vector.load %arg6[%c0_11, %c0_12] : memref<1x256xf32, #tpu.memory_space<vmem>>, vector<1x256xf32>
    %14 = vector.broadcast %13 : vector<1x256xf32> to vector<8x256xf32>
    %15 = arith.addf %12, %14 : vector<8x256xf32>
    %cst_13 = arith.constant 0.000000e+00 : f32
    %16 = vector.broadcast %cst_13 : f32 to vector<8x256xf32>
    %17 = arith.maximumf %15, %16 : vector<8x256xf32>
    %c0_14 = arith.constant 0 : index
    %c0_15 = arith.constant 0 : index
    %18 = vector.load %arg7[%c0_14, %c0_15] : memref<1x256xf32, #tpu.memory_space<vmem>>, vector<1x256xf32>
    %19 = vector.broadcast %1 : vector<8x1xf32> to vector<8x256xf32>
    %20 = vector.broadcast %18 : vector<1x256xf32> to vector<8x256xf32>
    %21 = arith.mulf %19, %20 : vector<8x256xf32>
    %c0_16 = arith.constant 0 : index
    %c0_17 = arith.constant 0 : index
    %22 = vector.load %arg8[%c0_16, %c0_17] : memref<1x256xf32, #tpu.memory_space<vmem>>, vector<1x256xf32>
    %23 = vector.broadcast %22 : vector<1x256xf32> to vector<8x256xf32>
    %24 = arith.addf %21, %23 : vector<8x256xf32>
    %cst_18 = arith.constant 0.000000e+00 : f32
    %25 = vector.broadcast %cst_18 : f32 to vector<8x256xf32>
    %26 = arith.maximumf %24, %25 : vector<8x256xf32>
    %c0_19 = arith.constant 0 : index
    %c0_20 = arith.constant 0 : index
    %27 = vector.load %arg9[%c0_19, %c0_20] : memref<1x256xf32, #tpu.memory_space<vmem>>, vector<1x256xf32>
    %28 = vector.broadcast %27 : vector<1x256xf32> to vector<8x256xf32>
    %29 = arith.mulf %26, %28 : vector<8x256xf32>
    %cst_21 = arith.constant dense<0.000000e+00> : vector<8xf32>
    %30 = vector.multi_reduction <add>, %29, %cst_21 [1] : vector<8x256xf32> to vector<8xf32>
    %31 = vector.shape_cast %30 : vector<8xf32> to vector<8x1xf32>
    %c0_22 = arith.constant 0 : index
    %c0_23 = arith.constant 0 : index
    %32 = vector.load %arg10[%c0_22, %c0_23] : memref<1x1xf32, #tpu.memory_space<vmem>>, vector<1x1xf32>
    %33 = vector.broadcast %32 : vector<1x1xf32> to vector<8x1xf32>
    %34 = arith.addf %31, %33 : vector<8x1xf32>
    %35 = arith.truncf %17 : vector<8x256xf32> to vector<8x256xbf16>
    %c0_24 = arith.constant 0 : index
    %c0_25 = arith.constant 0 : index
    %36 = vector.load %arg11[%c0_24, %c0_25] : memref<256x128xbf16, #tpu.memory_space<vmem>>, vector<256x128xbf16>
    %cst_26 = arith.constant dense<0.000000e+00> : vector<8x128xf32>
    %37 = tpu.matmul %35, %36, %cst_26 {dimension_numbers = #tpu.dot_dimension_numbers<[1], [0], [0], [1], [0, 0, 1, 1], [], []>} : vector<8x256xbf16>, vector<256x128xbf16>, vector<8x128xf32> -> vector<8x128xf32>
    %c0_27 = arith.constant 0 : index
    %c0_28 = arith.constant 0 : index
    %38 = vector.load %arg12[%c0_27, %c0_28] : memref<1x128xf32, #tpu.memory_space<vmem>>, vector<1x128xf32>
    %39 = vector.broadcast %38 : vector<1x128xf32> to vector<8x128xf32>
    %40 = arith.addf %37, %39 : vector<8x128xf32>
    %41 = vector.broadcast %34 : vector<8x1xf32> to vector<8x128xf32>
    %42 = arith.addf %40, %41 : vector<8x128xf32>
    %43 = arith.negf %42 : vector<8x128xf32>
    %44 = math.exp %43 : vector<8x128xf32>
    %cst_29 = arith.constant 1.000000e+00 : f32
    %45 = vector.broadcast %cst_29 : f32 to vector<8x128xf32>
    %46 = arith.addf %45, %44 : vector<8x128xf32>
    %47 = arith.divf %45, %46 : vector<8x128xf32>
    %c0_30 = arith.constant 0 : index
    %c0_31 = arith.constant 0 : index
    %48 = vector.load %arg13[%c0_30, %c0_31] : memref<8x128xf32, #tpu.memory_space<vmem>>, vector<8x128xf32>
    tpu.vector_store %arg13[%c0_30, %c0_31], %47 {strides = array<i32>} : memref<8x128xf32, #tpu.memory_space<vmem>>, vector<8x128xf32>,
    return
  }
  func.func @transform_0(%arg0: i32) -> (i32, i32) {
    %c0_i32 = arith.constant 0 : i32
    %c0_i32_0 = arith.constant 0 : i32
    return %arg0, %c0_i32 : i32, i32
  }
  func.func @transform_1(%arg0: i32) -> (i32, i32) {
    %c0_i32 = arith.constant 0 : i32
    %c0_i32_0 = arith.constant 0 : i32
    return %arg0, %c0_i32 : i32, i32
  }
  func.func @transform_2(%arg0: i32) -> (i32, i32) {
    %c0_i32 = arith.constant 0 : i32
    %c0_i32_0 = arith.constant 0 : i32
    %c0_i32_1 = arith.constant 0 : i32
    return %c0_i32, %c0_i32_0 : i32, i32
  }
  func.func @transform_3(%arg0: i32) -> (i32, i32) {
    %c0_i32 = arith.constant 0 : i32
    %c0_i32_0 = arith.constant 0 : i32
    %c0_i32_1 = arith.constant 0 : i32
    return %c0_i32, %c0_i32_0 : i32, i32
  }
  func.func @transform_4(%arg0: i32) -> (i32, i32) {
    %c0_i32 = arith.constant 0 : i32
    %c0_i32_0 = arith.constant 0 : i32
    %c0_i32_1 = arith.constant 0 : i32
    return %c0_i32, %c0_i32_0 : i32, i32
  }
  func.func @transform_5(%arg0: i32) -> (i32, i32) {
    %c0_i32 = arith.constant 0 : i32
    %c0_i32_0 = arith.constant 0 : i32
    %c0_i32_1 = arith.constant 0 : i32
    return %c0_i32, %c0_i32_0 : i32, i32
  }
  func.func @transform_6(%arg0: i32) -> (i32, i32) {
    %c0_i32 = arith.constant 0 : i32
    %c0_i32_0 = arith.constant 0 : i32
    %c0_i32_1 = arith.constant 0 : i32
    return %c0_i32, %c0_i32_0 : i32, i32
  }
  func.func @transform_7(%arg0: i32) -> (i32, i32) {
    %c0_i32 = arith.constant 0 : i32
    %c0_i32_0 = arith.constant 0 : i32
    %c0_i32_1 = arith.constant 0 : i32
    return %c0_i32, %c0_i32_0 : i32, i32
  }
  func.func @transform_8(%arg0: i32) -> (i32, i32) {
    %c0_i32 = arith.constant 0 : i32
    %c0_i32_0 = arith.constant 0 : i32
    %c0_i32_1 = arith.constant 0 : i32
    return %c0_i32, %c0_i32_0 : i32, i32
  }
  func.func @transform_9(%arg0: i32) -> (i32, i32) {
    %c0_i32 = arith.constant 0 : i32
    %c0_i32_0 = arith.constant 0 : i32
    %c0_i32_1 = arith.constant 0 : i32
    return %c0_i32, %c0_i32_0 : i32, i32
  }
  func.func @transform_10(%arg0: i32) -> (i32, i32) {
    %c0_i32 = arith.constant 0 : i32
    %c0_i32_0 = arith.constant 0 : i32
    %c0_i32_1 = arith.constant 0 : i32
    return %c0_i32, %c0_i32_0 : i32, i32
  }
  func.func @transform_11(%arg0: i32) -> (i32, i32) {
    %c0_i32 = arith.constant 0 : i32
    %c0_i32_0 = arith.constant 0 : i32
    %c0_i32_1 = arith.constant 0 : i32
    return %c0_i32, %c0_i32_0 : i32, i32
  }
  func.func @transform_12(%arg0: i32) -> (i32, i32) {
    %c0_i32 = arith.constant 0 : i32
    %c0_i32_0 = arith.constant 0 : i32
    return %arg0, %c0_i32 : i32, i32
  }
}

</mosaic_0001>

<bundles_post_ra>
// kernel: _forward_impl.1
= control target key start
LH: loop header
LB: loop body
LE: loop exit
PB: predicated region body
PF: predicated region fallthrough
CT: control target
= control target key end

     0   :  { %s1117_s0 = inlined_call_operand.vmem [shape: f32[8,96], index: 0, kind: input, shape index: {}]   ;;  %s1118_s1 = inlined_call_operand.vmem [shape: f32[8,1], index: 1, kind: input, shape index: {}]   ;;  %s1119_s2 = inlined_call_operand.hbm [shape: bf16[96,256], index: 2, kind: input, shape index: {}]   ;;  %s1120_s3 = inlined_call_operand.vmem [shape: f32[1,256], index: 3, kind: input, shape index: {}]   ;;  %s1121_s4 = inlined_call_operand.hbm [shape: bf16[256,256], index: 4, kind: input, shape index: {}]   ;;  %s1122_s5 = inlined_call_operand.vmem [shape: f32[1,256], index: 5, kind: input, shape index: {}]   ;;  %s1123_s6 = inlined_call_operand.vmem [shape: f32[1,256], index: 6, kind: input, shape index: {}]   ;;  %s1124_s7 = inlined_call_operand.vmem [shape: f32[1,256], index: 7, kind: input, shape index: {}]   ;;  %s1125_s8 = inlined_call_operand.vmem [shape: f32[1,256], index: 8, kind: input, shape index: {}]   ;;  %s1126_s9 = inlined_call_operand.<no memory space> [shape: f32[1,1], index: 9, kind: input, shape index: {}]   ;;  %s1127_s10 = inlined_call_operand.hbm [shape: bf16[256,128], index: 10, kind: input, shape index: {}]   ;;  %s1128_s11 = inlined_call_operand.vmem [shape: f32[1,128], index: 11, kind: input, shape index: {}]   ;;  %s1129_s12 = inlined_call_operand.hbm [shape: f32[8,128], index: 12, kind: output, shape index: {}]  }
   0x1   :  { %v17_v0 = vstv %s1126_s9 }
   0x2   :  { %18 = vst [vmem:[#allocation2] sm:$0x1] %v17_v0 }
   0x3   :  { %19 = vsyncpa [#allocation4], 0 }
   0x4   :  { %20 = vsyncpa [#allocation7], 0 }
   0x5   :  { %21 = vsyncpa [#allocation5], 0  ;;  %s1004_s23 = smov [#allocation6]   ;;  %s1005_s25 = smov [#allocation3]  }
   0x6   :  { %s45_s24 = sshll.u32 %s1004_s23, 4  ;;  %s31_s26 = sshll.u32 %s1005_s25, 4  ;;  %s46_s24 = int_to_ptr.vmem [resolvable:$true] %s45_s24  ;;  %s32_s26 = int_to_ptr.vmem [resolvable:$true] %s31_s26 }
   0x7   :  { %s926_s27 = scalar_lea.vmem %s46_s24, 4096  ;;  %p931_p1 = scmp.lt.s32.totalorder %s46_s24, %s46_s24 }
   0x8   :  { %p927_p0 = scmp.ne.s32.totalorder %s46_s24, %s926_s27  ;;  %p932_p2 = scmp.lt.s32.totalorder %s926_s27, %s926_s27 }
   0xa   :  { %p933_p3 = por %p932_p2, %p931_p1 }
   0xc   :  { %p934_p4 = pnand %p933_p3, %p927_p0 }
   0xe   :  { %937 = shalt.err (!%p934_p4)
}
   0xf   :  { %s1006_s28 = smov 128   ;;  %s1007_s29 = smov 8  }
  0x10   :  { %51 = dma.hbm_to_vmem [thread:$0]  %s1121_s4, 4096, %s46_s24, [#allocation7], %s1006_s28, %s1006_s28, %s1007_s29  }
  0x11   :  { %s946_s13 = scalar_lea.vmem %s32_s26, 1536  ;;  %p951_p6 = scmp.lt.s32.totalorder %s32_s26, %s32_s26 }
  0x12   :  { %p947_p5 = scmp.ne.s32.totalorder %s32_s26, %s946_s13  ;;  %p952_p7 = scmp.lt.s32.totalorder %s946_s13, %s946_s13 }
  0x14   :  { %p953_p8 = por %p952_p7, %p951_p6 }
  0x16   :  { %p954_p9 = pnand %p953_p8, %p947_p5 }
  0x18   :  { %957 = shalt.err (!%p954_p9)
}
  0x19   :  { %37 = dma.hbm_to_vmem [thread:$0]  %s1119_s2, 1536, %s32_s26, [#allocation4], %s1006_s28, %s1006_s28, %s1007_s29  }
  0x1a   :  { %s1008_s16 = smov [#allocation8]  }
  0x1b   :  { %s67_s17 = sshll.u32 %s1008_s16, 4  ;;  %s68_s17 = int_to_ptr.vmem [resolvable:$true] %s67_s17 }
  0x1c   :  { %s966_s18 = scalar_lea.vmem %s68_s17, 2048  ;;  %p971_p11 = scmp.lt.s32.totalorder %s68_s17, %s68_s17 }
  0x1d   :  { %p967_p10 = scmp.ne.s32.totalorder %s68_s17, %s966_s18  ;;  %p972_p12 = scmp.lt.s32.totalorder %s966_s18, %s966_s18 }
  0x1f   :  { %p973_p13 = por %p972_p12, %p971_p11 }
  0x21   :  { %p974_p0 = pnand %p973_p13, %p967_p10 }
  0x23   :  { %977 = shalt.err (!%p974_p0)
}
  0x24   :  { %s1009_s4 = smov 64   ;;  %s1010_s19 = smov 4  }
  0x25   :  { %73 = dma.hbm_to_vmem [thread:$0]  %s1127_s10, 2048, %s68_s17, [#allocation7], %s1009_s4, %s1009_s4, %s1010_s19  }
  0x26   :  { %998 = dma.done.wait [#allocation4], 1536  }
  0x27   :  { %999 = vsyncadd [#allocation4], 4294965760 }
  0x28   :  { %1000 = dma.done.wait [#allocation7], 6144  }
  0x29   :  { %1001 = vsyncadd [#allocation7], 4294961152  ;;  %v1011_v1 = vmov 0   ;;  %v832_v2 = vld [vmem:[#allocation3 + $0x54] ss:$8 sps:$4 sm:$0xff]   ;;  %vm173_vm0 = vcmask 785408   ;;  %v103_v61 = vlaneseq }
  0x2a   :  { %209 = vmatprep.mubr.bf16.mxu0 %v1011_v1  ;;  %830 = vset.pattern.permute.xlu0 %v1011_v1  ;;  %v834_v3 = vld [vmem:[#allocation3 + $0x50] ss:$8 sps:$4 sm:$0xff]   ;;  %v835_v4 = vld [vmem:[#allocation3 + $0x44] ss:$8 sps:$4 sm:$0xff]   ;;  %v837_v5 = vld [vmem:[#allocation3 + $0x40] ss:$8 sps:$4 sm:$0xff]  }
  0x2b   :  { %831 = vset.pattern.permute.xlu1 %v1011_v1  ;;  %181 = vmatprep.subr.bf16.mxu0 %v832_v2  ;;  %v838_v6 = vld [vmem:[#allocation3 + $0x34] ss:$8 sps:$4 sm:$0xff]   ;;  %v840_v7 = vld [vmem:[#allocation3 + $0x30] ss:$8 sps:$4 sm:$0xff]   ;;  %v841_v8 = vld [vmem:[#allocation3 + $0x24] ss:$8 sps:$4 sm:$0xff]  }
  0x2c   :  { %182 = vmatpush1.bf16.msra.mxu0 %v834_v3  ;;  %v850_v9 = vld [vmem:[#allocation6 + $0x74] ss:$8 sps:$4 sm:$0xff]   ;;  %v852_v10 = vld [vmem:[#allocation6 + $0x70] ss:$8 sps:$4 sm:$0xff]   ;;  %v843_v11 = vld [vmem:[#allocation3 + $0x20] ss:$8 sps:$4 sm:$0xff]  }
  0x2d   :  { %183 = vmatprep.subr.bf16.mxu0 %v835_v4  ;;  %v853_v12 = vld [vmem:[#allocation6 + $0x64] ss:$8 sps:$4 sm:$0xff]   ;;  %v844_v13 = vld [vmem:[#allocation3 + $0x14] ss:$8 sps:$4 sm:$0xff]   ;;  %426 = vmatprep.subr.bf16.mxu1 %v850_v9  ;;  %v855_v14 = vld [vmem:[#allocation6 + $0x60] ss:$8 sps:$4 sm:$0xff]  }
  0x2e   :  { %427 = vmatpush1.bf16.msra.mxu1 %v852_v10  ;;  %v856_v15 = vld [vmem:[#allocation6 + $0x54] ss:$8 sps:$4 sm:$0xff]   ;;  %v846_v16 = vld [vmem:[#allocation3 + $0x10] ss:$8 sps:$4 sm:$0xff]   ;;  %v847_v17 = vld [vmem:[#allocation3 + $0x4] ss:$8 sps:$4 sm:$0xff]  }
  0x2f   :  { %428 = vmatprep.subr.bf16.mxu1 %v853_v12  ;;  %v858_v18 = vld [vmem:[#allocation6 + $0x50] ss:$8 sps:$4 sm:$0xff]   ;;  %v859_v19 = vld [vmem:[#allocation6 + $0x44] ss:$8 sps:$4 sm:$0xff]   ;;  %v849_v20 = vld [vmem:[#allocation3] ss:$8 sps:$4 sm:$0xff]  }
  0x30   :  { %184 = vmatpush1.bf16.msra.mxu0 %v837_v5  ;;  %v86_v21 = vld [vmem:[%s1117_s0] sm:$0xff]  ;;  %v864_v25 = vld [vmem:[#allocation6 + $0x30] ss:$8 sps:$4 sm:$0xff]   ;;  %v902_v53 = vld [vmem:[#allocation8 + $0x68] sm:$0xff]   ;;  %v104_v62 = vshrl.u32 %v103_v61, 7 }
  0x31   :  { %185 = vmatprep.subr.bf16.mxu0 %v838_v6  ;;  %v861_v22 = vld [vmem:[#allocation6 + $0x40] ss:$8 sps:$4 sm:$0xff]   ;;  %v862_v23 = vld [vmem:[#allocation6 + $0x34] ss:$8 sps:$4 sm:$0xff]   ;;  %v88_v24 = vpack.c.bf16 %v86_v21, %v86_v21  ;;  %v865_v26 = vld [vmem:[#allocation6 + $0x24] ss:$8 sps:$4 sm:$0xff]  }
  0x32   :  { %429 = vmatpush1.bf16.msra.mxu1 %v855_v14  ;;  %v867_v27 = vld [vmem:[#allocation6 + $0x20] ss:$8 sps:$4 sm:$0xff]   ;;  %v868_v28 = vld [vmem:[#allocation6 + $0x14] ss:$8 sps:$4 sm:$0xff]   ;;  %v870_v29 = vld [vmem:[#allocation6 + $0x10] ss:$8 sps:$4 sm:$0xff]  }
  0x33   :  { %430 = vmatprep.subr.bf16.mxu1 %v856_v15  ;;  %v871_v30 = vld [vmem:[#allocation6 + $0x4] ss:$8 sps:$4 sm:$0xff]   ;;  %v873_v31 = vld [vmem:[#allocation6] ss:$8 sps:$4 sm:$0xff]   ;;  %v874_v32 = vld [vmem:[#allocation6 + $0xf4] ss:$8 sps:$4 sm:$0xff]  }
  0x34   :  { %186 = vmatpush1.bf16.msra.mxu0 %v840_v7  ;;  %v876_v33 = vld [vmem:[#allocation6 + $0xf0] ss:$8 sps:$4 sm:$0xff]   ;;  %v877_v34 = vld [vmem:[#allocation6 + $0xe4] ss:$8 sps:$4 sm:$0xff]   ;;  %v879_v35 = vld [vmem:[#allocation6 + $0xe0] ss:$8 sps:$4 sm:$0xff]  }
  0x35   :  { %187 = vmatprep.subr.bf16.mxu0 %v841_v8  ;;  %v880_v36 = vld [vmem:[#allocation6 + $0xd4] ss:$8 sps:$4 sm:$0xff]   ;;  %v882_v37 = vld [vmem:[#allocation6 + $0xd0] ss:$8 sps:$4 sm:$0xff]   ;;  %v883_v38 = vld [vmem:[#allocation6 + $0xc4] ss:$8 sps:$4 sm:$0xff]  }
  0x36   :  { %431 = vmatpush1.bf16.msra.mxu1 %v858_v18  ;;  %v885_v39 = vld [vmem:[#allocation6 + $0xc0] ss:$8 sps:$4 sm:$0xff]   ;;  %v886_v40 = vld [vmem:[#allocation6 + $0xb4] ss:$8 sps:$4 sm:$0xff]   ;;  %v888_v41 = vld [vmem:[#allocation6 + $0xb0] ss:$8 sps:$4 sm:$0xff]  }
  0x37   :  { %432 = vmatprep.subr.bf16.mxu1 %v859_v19  ;;  %v889_v42 = vld [vmem:[#allocation6 + $0xa4] ss:$8 sps:$4 sm:$0xff]   ;;  %v891_v43 = vld [vmem:[#allocation6 + $0xa0] ss:$8 sps:$4 sm:$0xff]   ;;  %v892_v44 = vld [vmem:[#allocation6 + $0x94] ss:$8 sps:$4 sm:$0xff]  }
  0x38   :  { %188 = vmatpush1.bf16.msra.mxu0 %v843_v11  ;;  %v894_v45 = vld [vmem:[#allocation6 + $0x90] ss:$8 sps:$4 sm:$0xff]   ;;  %v895_v46 = vld [vmem:[#allocation6 + $0x84] ss:$8 sps:$4 sm:$0xff]   ;;  %v897_v47 = vld [vmem:[#allocation6 + $0x80] ss:$8 sps:$4 sm:$0xff]  }
  0x39   :  { %189 = vmatprep.subr.bf16.mxu0 %v844_v13  ;;  %v87_v48 = vld [vmem:[%s1118_s1] sm:$0xff]  ;;  %v900_v51 = vld [vmem:[#allocation8 + $0x70] sm:$0xff]   ;;  %v903_v54 = vld [vmem:[#allocation8 + $0x28] sm:$0xff]   ;;  %v105_v63 = vsub.s32 0, %v104_v62  ;;  %v109_v1 = vsub.s32 1, %v104_v62 }
  0x3a   :  { %433 = vmatpush1.bf16.msra.mxu1 %v861_v22  ;;  %472 = vperm.xlu0 %830, %v87_v48   ;;  %v898_v49 = vld [vmem:[#allocation8 + $0x78] sm:$0xff]   ;;  %v901_v52 = vld [vmem:[#allocation8 + $0x30] sm:$0xff]   ;;  %v904_v55 = vld [vmem:[#allocation8 + $0x60] sm:$0xff]  }
  0x3b   :  { %434 = vmatprep.subr.bf16.mxu1 %v862_v23  ;;  %v899_v50 = vld [vmem:[#allocation8 + $0x38] sm:$0xff]   ;;  %v905_v56 = vld [vmem:[#allocation8 + $0x20] sm:$0xff]   ;;  %v908_v59 = vld [vmem:[#allocation8 + $0x50] sm:$0xff]  }
  0x3c   :  { %190 = vmatpush1.bf16.msra.mxu0 %v846_v16  ;;  %v906_v57 = vld [vmem:[#allocation8 + $0x58] sm:$0xff]   ;;  %v909_v60 = vld [vmem:[#allocation8 + $0x10] sm:$0xff]  }
  0x3d   :  { %191 = vmatprep.subr.bf16.mxu0 %v847_v17  ;;  %v907_v58 = vld [vmem:[#allocation8 + $0x18] sm:$0xff]  }
  0x3e   :  { %435 = vmatpush1.bf16.msra.mxu1 %v864_v25  ;;  %v101_v0 = vld [vmem:[%s1120_s3] sm:$0x3] }
  0x3f   :  { %436 = vmatprep.subr.bf16.mxu1 %v865_v26  ;;  %v106_v2 = vrot.slane %v101_v0, %v105_v63  ;;  %v110_v3 = vrot.slane %v101_v0, %v109_v1  ;;  %v469_v5 = vld [vmem:[%s1123_s6] sm:$0x3] }
  0x40   :  { %192 = vmatpush1.bf16.msra.mxu0 %v849_v20  ;;  %v488_v8 = vld [vmem:[%s1124_s7] sm:$0x3]  ;;  %v479_v10 = vrot.slane %v469_v5, %v105_v63  ;;  %v483_v11 = vrot.slane %v469_v5, %v109_v1 }
  0x41   :  { %799 = vmatprep.subr.bf16.mxu0 %v898_v49  ;;  %v493_v15 = vrot.slane %v488_v8, %v105_v63  ;;  %v497_v16 = vrot.slane %v488_v8, %v109_v1  ;;  %v504_v19 = vld [vmem:[%s1125_s8] sm:$0x3] }
  0x42   :  { %437 = vmatpush1.bf16.msra.mxu1 %v867_v27  ;;  %v509_v26 = vrot.slane %v504_v19, %v105_v63  ;;  %v513_v27 = vrot.slane %v504_v19, %v109_v1 }
  0x43   :  { %747 = vmatmul.mubr.msk.bf16.vlgmr.msra.gmra.mxu0 %vm173_vm0, %v88_v24  ;;  %438 = vmatprep.subr.bf16.mxu1 %v868_v28 }
  0x44   :  { %800 = vmatpush3.bf16.msra.mxu0 %v899_v50 }
  0x45   :  { %801 = vmatprep.subr.bf16.mxu0 %v900_v51 }
  0x46   :  { %439 = vmatpush1.bf16.msra.mxu1 %v870_v29 }
  0x47   :  { %440 = vmatprep.subr.bf16.mxu1 %v871_v30 }
  0x48   :  { %802 = vmatpush3.bf16.msra.mxu0 %v901_v52 }
  0x49   :  { %803 = vmatprep.subr.bf16.mxu0 %v902_v53 }
  0x4a   :  { %441 = vmatpush1.bf16.msra.mxu1 %v873_v31 }
  0x4b   :  { %442 = vmatprep.subr.bf16.mxu1 %v874_v32 }
  0x4c   :  { %804 = vmatpush3.bf16.msra.mxu0 %v903_v54 }
  0x4d   :  { %805 = vmatprep.subr.bf16.mxu0 %v904_v55  ;;  %v781_v55 = vld [vmem:[%s1128_s11] ss:$0 sm:$0xff] }
  0x4e   :  { %443 = vmatpush2.bf16.msra.mxu1 %v876_v33  ;;  %v910_v33 = vld [vmem:[#allocation8 + $0x48] sm:$0xff]  }
  0x4f   :  { %444 = vmatprep.subr.bf16.mxu1 %v877_v34  ;;  %v911_v34 = vld [vmem:[#allocation8 + $0x8] sm:$0xff]  }
  0x50   :  { %806 = vmatpush3.bf16.msra.mxu0 %v905_v56 }
  0x51   :  { %807 = vmatprep.subr.bf16.mxu0 %v906_v57 }
  0x52   :  { %445 = vmatpush2.bf16.msra.mxu1 %v879_v35  ;;  %v912_v35 = vld [vmem:[#allocation8 + $0x40] sm:$0xff]  }
  0x53   :  { %446 = vmatprep.subr.bf16.mxu1 %v880_v36  ;;  %v913_v36 = vld [vmem:[#allocation8] sm:$0xff]  }
  0x54   :  { %808 = vmatpush3.bf16.msra.mxu0 %v907_v58 }
  0x55   :  { %809 = vmatprep.subr.bf16.mxu0 %v908_v59 }
  0x56   :  { %447 = vmatpush2.bf16.msra.mxu1 %v882_v37  ;;  %v780_v37 = vld [vmem:[#allocation2] ss:$0 sm:$0xff] }
  0x57   :  { %448 = vmatprep.subr.bf16.mxu1 %v883_v38 }
  0x58   :  { %810 = vmatpush3.bf16.msra.mxu0 %v909_v60 }
  0x59   :  { %811 = vmatprep.subr.bf16.mxu0 %v910_v33 }
  0x5a   :  { %449 = vmatpush2.bf16.msra.mxu1 %v885_v39 }
  0x5b   :  { %450 = vmatprep.subr.bf16.mxu1 %v886_v40  ;;  %v254_v40 = vld [vmem:[%s1122_s5] sm:$0x3]  ;;  %s1012_s5 = smov [#allocation9]  }
  0x5c   :  { %812 = vmatpush3.bf16.msra.mxu0 %v911_v34  ;;  %s725_s9 = sshll.u32 %s1012_s5, 4  ;;  %s726_s9 = int_to_ptr.vmem [resolvable:$true] %s725_s9 }
  0x5d   :  { %813 = vmatprep.subr.bf16.mxu0 %v912_v35  ;;  %s978_s30 = scalar_lea.vmem %s726_s9, 128  ;;  %p983_p2 = scmp.lt.s32.totalorder %s726_s9, %s726_s9 }
  0x5e   :  { %451 = vmatpush2.bf16.msra.mxu1 %v888_v41  ;;  %v259_v41 = vrot.slane %v254_v40, %v105_v63  ;;  %p979_p1 = scmp.ne.s32.totalorder %s726_s9, %s978_s30  ;;  %p984_p3 = scmp.lt.s32.totalorder %s978_s30, %s978_s30 }
  0x5f   :  { %452 = vmatprep.subr.bf16.mxu1 %v889_v42  ;;  %v263_v42 = vrot.slane %v254_v40, %v109_v1 }
  0x60   :  { %814 = vmatpush3.bf16.msra.mxu0 %v913_v36  ;;  %p985_p4 = por %p984_p3, %p983_p2 }
  0x62   :  { %453 = vmatpush2.bf16.msra.mxu1 %v891_v43  ;;  %p986_p5 = pnand %p985_p4, %p979_p1 }
  0x63   :  { %454 = vmatprep.subr.bf16.mxu1 %v892_v44 }
  0x66   :  { %455 = vmatpush2.bf16.msra.mxu1 %v894_v45 }
  0x67   :  { %456 = vmatprep.subr.bf16.mxu1 %v895_v46 }
  0x6a   :  { %457 = vmatpush2.bf16.msra.mxu1 %v897_v47 }
  0xb5   :  { %v473_v18 = vpop.permute.xlu0 %472 }
  0xb6   :  { %v486_v21 = vmul.f32 %v479_v10, %v473_v18  ;;  %v487_v22 = vmul.f32 %v483_v11, %v473_v18 }
  0xb8   :  { %v500_v24 = vadd.f32 %v493_v15, %v486_v21  ;;  %v501_v25 = vadd.f32 %v497_v16, %v487_v22 }
  0xba   :  { %v502_v28 = vmax.f32 %v500_v24, 0.0  ;;  %v503_v29 = vmax.f32 %v501_v25, 0.0 }
  0xbc   :  { %v516_v30 = vmul.f32 %v509_v26, %v502_v28  ;;  %v517_v31 = vmul.f32 %v513_v27, %v503_v29 }
  0xbe   :  { %v518_v32 = vadd.f32 %v517_v31, %v516_v30 }
  0xc0   :  { %519 = vadd.xlane.f32.xlu0 %v518_v32 }
 0x103   :  { %v211_v4 = vpop.f32.mrf.mxu0 }
 0x104   :  { %v212_v6 = vadd.f32 %v211_v4, %v106_v2 }
 0x105   :  { %v213_v7 = vpop.f32.mrf.mxu0 }
 0x106   :  { %v214_v9 = vadd.f32 %v213_v7, %v110_v3  ;;  %v218_v12 = vmax.f32 %v212_v6, 0.0 }
 0x107   :  { %v215_v13 = vpop.f32.mrf.mxu0 }
 0x108   :  { %v219_v14 = vmax.f32 %v214_v9, 0.0  ;;  %v220_v23 = vpack.c.bf16 %v218_v12, %v218_v12 }
 0x109   :  { %v216_v17 = vpop.f32.mrf.mxu0 }
 0x10a   :  { %v221_v20 = vpack.c.bf16 %v219_v14, %v219_v14 }
 0x10c   :  { %458 = vmatprep.mubr.bf16.mxu1 %v221_v20 }
 0x10d   :  { %459 = vmatmul.mubr.bf16.vlgmr.msra.gmra.mxu1 %v220_v23 }
 0x149   :  { %v520_v38 = vpop.xlane.xlu0 %519 }
 0x14a   :  { %v528_v39 = vadd.f32 %v780_v37, %v520_v38 }
 0x14c   :  { %708 = vperm.xlu1 %831, %v528_v39  }
 0x1c7   :  { %v709_v58 = vpop.permute.xlu1 %708 }
 0x1cd   :  { %v460_v43 = vpop.f32.mrf.mxu1 }
 0x1ce   :  { %v461_v44 = vadd.f32 %v460_v43, %v259_v41 }
 0x1cf   :  { %v462_v45 = vpop.f32.mrf.mxu1 }
 0x1d0   :  { %v463_v46 = vadd.f32 %v462_v45, %v263_v42  ;;  %v467_v47 = vmax.f32 %v461_v44, 0.0 }
 0x1d1   :  { %v464_v48 = vpop.f32.mrf.mxu1 }
 0x1d2   :  { %v468_v49 = vmax.f32 %v463_v46, 0.0  ;;  %v529_v52 = vpack.c.bf16 %v467_v47, %v467_v47 }
 0x1d3   :  { %v465_v50 = vpop.f32.mrf.mxu1 }
 0x1d4   :  { %v530_v51 = vpack.c.bf16 %v468_v49, %v468_v49 }
 0x1d6   :  { %698 = vmatprep.mubr.bf16.mxu0 %v530_v51 }
 0x1d7   :  { %699 = vmatmul.mubr.bf16.vlgmr.msra.gmra.mxu0 %v529_v52 }
 0x297   :  { %v815_v53 = vpop.f32.mrf.mxu0 }
 0x299   :  { %v816_v54 = vpop.f32.mrf.mxu0 }
 0x29a   :  { %v817_v56 = vadd.f32 %v816_v54, %v815_v53 }
 0x29b   :  { %v818_v57 = vpop.f32.mrf.mxu0 }
 0x29c   :  { %v701_v59 = vadd.f32 %v817_v56, %v781_v55 }
 0x29d   :  { %v819_v60 = vpop.f32.mrf.mxu0 }
 0x29e   :  { %v711_v61 = vadd.f32 %v709_v58, %v701_v59 }
 0x2a0   :  { %v798_v62 = vmul.f32 -1.442695, %v711_v61 }
 0x2a2   :  { %914 = vpow2.f32 %v798_v62 }
 0x2af   :  { %v915_v63 = vpop.eup %914 }
 0x2b0   :  { %v715_v0 = vadd.f32 1.0, %v915_v63 }
 0x2b2   :  { %916 = vrcp.f32 %v715_v0 }
 0x2bf   :  { %v917_v1 = vpop.eup %916 }
 0x2c0   :  { %718 = vst [vmem:[#allocation9] sm:$0xff] %v917_v1 }
 0x2c1   :  { %989 = shalt.err (!%p986_p5)
}
 0x2c2   :  { %728 = dma.vmem_to_hbm [thread:$0]  %s726_s9, 128, %s1129_s12, [#allocation5]  }
 0x2c3   :  { %1002 = dma.done.wait [#allocation5], 128  }
 0x2c4   :  { %1003 = vsyncadd [#allocation5], 4294967168 }
 0x2c5   :  { %732 = vsyncpa [#allocation4], 1 }
 0x2c6   :  { %733 = vsyncpa [#allocation7], 1 }
 0x2c7   :  { %734 = vsyncpa [#allocation5], 1 }

</bundles_post_ra>
